<compile_context>
chip_gen: v7x
topology: tpu7x:2x2x1
jax: 0.10.0
libtpu: 0.0.40
codegen_flags: <defaults>
</compile_context>

<pallas_src>
import jax
import jax.numpy as jnp
from jax.experimental import pallas as pl
from jax.experimental.pallas import tpu as pltpu


def _round_up(x: int, m: int) -> int:
    return ((x + m - 1) // m) * m


def prepare_context_params(weight, bias, dtype=None):
    """One-time weight prep -- keep OUT of the per-step hot path.

    weight: (H, C+H) torch nn.Linear layout; bias: (H,)
    Returns:
      w_cat: (Cp+Hp, Hp)  rows [0,C) = Wq^T, rows [Cp,Cp+H) = Wh^T, rest zero
      b_pad: (1, Hp)      bias zero-padded along the lane axis
    with Cp = round_up(C,128), Hp = round_up(H,128) (lane-dense K and N).
    """
    H, fan_in = weight.shape
    C = fan_in - H
    assert bias.shape == (H,)
    if dtype is None:
        dtype = weight.dtype
    Cp = _round_up(C, 128)
    Hp = _round_up(H, 128)
    w_cat = jnp.zeros((Cp + Hp, Hp), dtype)
    w_cat = w_cat.at[:C, :H].set(weight[:, :C].T.astype(dtype))
    w_cat = w_cat.at[Cp:Cp + H, :H].set(weight[:, C:].T.astype(dtype))
    b_pad = jnp.zeros((1, Hp), dtype).at[0, :H].set(bias.astype(dtype))
    return w_cat, b_pad


def _make_kernel(C, H, Cp, Hp):
    Kp = Cp + Hp

    def kernel(q_ref, h_ref, w_ref, b_ref, o_ref, x_ref):
        # Lane-aligned "virtual concat" [ q | 0 | h | 0 ] in VMEM scratch.
        # Zero the padding lanes every step (uninitialized VMEM could hold NaN
        # and 0-weight * NaN = NaN); Python `if` skips this when dims align.
        bm = x_ref.shape[0]
        if C != Cp:
            x_ref[:, C:Cp] = jnp.zeros((bm, Cp - C), x_ref.dtype)
        if Cp + H != Kp:
            x_ref[:, Cp + H:] = jnp.zeros((bm, Kp - Cp - H), x_ref.dtype)
        x_ref[:, :C] = q_ref[...]
        x_ref[:, Cp:Cp + H] = h_ref[...]

        # Single fused MXU matmul over K = Cp+Hp, f32 accumulation.
        acc = jnp.dot(x_ref[...], w_ref[...], preferred_element_type=jnp.float32)
        acc = acc + b_ref[...].astype(jnp.float32)      # bias broadcast over rows
        # Dropout == identity (eval-mode deterministic forward).
        o_ref[...] = jnp.tanh(acc).astype(o_ref.dtype)

    return kernel


def context_layer(queried, h, w_cat, b_pad, *, block_b=None):
    """queried: (B, C), h: (B, H); w_cat/b_pad from prepare_context_params.
    Returns (B, H) = tanh(cat([queried, h], 1) @ weight.T + bias)."""
    B, C = queried.shape
    Bh, H = h.shape
    assert Bh == B
    Kp, Hp = w_cat.shape
    Cp = Kp - Hp
    assert C <= Cp and H <= Hp and b_pad.shape == (1, Hp)

    # Batch tiling: multiple of 8 sublanes, capped at 512 rows, and >=2 grid
    # steps when the batch allows (DMA/compute overlap + v7x dual-TC sharding).
    if block_b is None:
        block_b = min(512, _round_up(pl.cdiv(B, 2), 8)) if B > 8 else 8
    block_b = max(8, _round_up(block_b, 8))
    grid = (pl.cdiv(B, block_b),)

    itemsize = jnp.dtype(queried.dtype).itemsize
    weight_bytes = (w_cat.size * jnp.dtype(w_cat.dtype).itemsize
                    + b_pad.size * jnp.dtype(b_pad.dtype).itemsize)
    # Worst-case (double-buffered weights) VMEM footprint estimate.
    est_vmem = (2 * weight_bytes
                + 2 * block_b * (C + H + Hp) * itemsize
                + block_b * Kp * itemsize)
    vmem_limit = None
    if est_vmem > (30 << 20):
        # Default scoped VMEM (~32 MiB) would spill/fail; raise with headroom.
        # (On v7x keep resident weights well under 64 MiB -- see K-tiling TODO.)
        vmem_limit = min(int(est_vmem * 1.25), 96 << 20)

    cost = pl.CostEstimate(
        flops=2 * B * (C + H) * H,
        transcendentals=B * H,
        bytes_accessed=(queried.size + h.size + B * Hp) * itemsize + weight_bytes,
    )

    kernel = _make_kernel(C, H, Cp, Hp)
    out_shape = jax.ShapeDtypeStruct((B, Hp), queried.dtype)

    def build(single_buffer_weights):
        # Constant-index weights/bias are fetched once; a single buffer halves
        # their VMEM footprint (matters for large H, esp. v7x's 64 MiB VMEM).
        wkw = dict(pipeline_mode=pl.Buffered(1)) if single_buffer_weights else {}
        grid_spec = pltpu.PrefetchScalarGridSpec(
            num_scalar_prefetch=0,
            grid=grid,
            in_specs=[
                pl.BlockSpec((block_b, C), lambda i: (i, 0)),       # queried tile
                pl.BlockSpec((block_b, H), lambda i: (i, 0)),       # h tile
                pl.BlockSpec((Kp, Hp), lambda i: (0, 0), **wkw),    # fused weight
                pl.BlockSpec((1, Hp), lambda i: (0, 0), **wkw),     # bias
            ],
            out_specs=pl.BlockSpec((block_b, Hp), lambda i: (i, 0)),
            scratch_shapes=[pltpu.VMEM((block_b, Kp), queried.dtype)],
        )
        return pl.pallas_call(
            kernel,
            out_shape=out_shape,
            grid_spec=grid_spec,
            compiler_params=pltpu.CompilerParams(
                dimension_semantics=("parallel",),
                vmem_limit_bytes=vmem_limit,
            ),
            cost_estimate=cost,
        )

    try:
        out_padded = build(True)(queried, h, w_cat, b_pad)
    except Exception:
        # pl.Buffered(1) not supported by this jax version/backend; fall back
        # to default (double-buffered) specs -- numerically identical.
        out_padded = build(False)(queried, h, w_cat, b_pad)

    return out_padded[:, :H]


def _reference(queried, h, weight, bias):
    x = jnp.concatenate([queried, h], axis=1)
    return jnp.tanh(x @ weight.T + bias)


if __name__ == "__main__":
    B, hid_dim, context_dim = 8, 32, 32

    key = jax.random.PRNGKey(0)
    k_q, k_h, k_w, k_b = jax.random.split(key, 4)

    queried = jax.random.normal(k_q, (B, context_dim), dtype=jnp.float32)
    h = jax.random.normal(k_h, (B, hid_dim), dtype=jnp.float32)

    # Deterministic init mimicking torch.nn.Linear default uniform(-1/sqrt(fan_in), +).
    fan_in = context_dim + hid_dim
    bound = 1.0 / (fan_in ** 0.5)
    weight = jax.random.uniform(k_w, (hid_dim, fan_in),
                                minval=-bound, maxval=bound, dtype=jnp.float32)
    bias = jax.random.uniform(k_b, (hid_dim,),
                              minval=-bound, maxval=bound, dtype=jnp.float32)

    # One-time weight prep (outside the hot path).
    w_cat, b_pad = prepare_context_params(weight, bias)

    out = context_layer(queried, h, w_cat, b_pad)
    out = jax.block_until_ready(out)

    ref = _reference(queried, h, weight, bias)
    assert out.shape == (B, hid_dim)
    assert jnp.allclose(out, ref, atol=1e-5, rtol=1e-5), "mismatch vs reference"

    print("KERNEL_OK")
</pallas_src>

<mosaic_0001>
module attributes {stable_mosaic.version = 11 : i64} {
  func.func @kernel(%arg0: i32, %arg1: memref<8x32xf32, #tpu.memory_space<vmem>>, %arg2: memref<8x32xf32, #tpu.memory_space<vmem>>, %arg3: memref<256x128xf32, #tpu.memory_space<vmem>>, %arg4: memref<1x128xf32, #tpu.memory_space<vmem>>, %arg5: memref<8x128xf32, #tpu.memory_space<vmem>>, %arg6: memref<8x256xf32, #tpu.memory_space<vmem>>) attributes {dimension_semantics = [#tpu.dimension_semantics<parallel>], iteration_bounds = array<i64: 1>, scalar_prefetch = 0 : i64, scratch_operands = 1 : i64, tpu.core_type = #tpu.core_type<tc>, window_params = [{transform_indices = @transform_0, window_bounds = array<i64: 8, 32>}, {transform_indices = @transform_1, window_bounds = array<i64: 8, 32>}, {pipeline_mode = #tpu.pipeline_mode<synchronous>, transform_indices = @transform_2, window_bounds = array<i64: 256, 128>}, {pipeline_mode = #tpu.pipeline_mode<synchronous>, transform_indices = @transform_3, window_bounds = array<i64: 1, 128>}, {transform_indices = @transform_4, window_bounds = array<i64: 8, 128>}]} {
    %cst = arith.constant 0.000000e+00 : f32
    %0 = vector.broadcast %cst : f32 to vector<8x96xf32>
    %c0 = arith.constant 0 : index
    %c32 = arith.constant 32 : index
    %1 = vector.load %arg6[%c0, %c32] : memref<8x256xf32, #tpu.memory_space<vmem>>, vector<8x96xf32>
    tpu.vector_store %arg6[%c0, %c32], %0 {strides = array<i32>} : memref<8x256xf32, #tpu.memory_space<vmem>>, vector<8x96xf32>,
    %cst_0 = arith.constant 0.000000e+00 : f32
    %2 = vector.broadcast %cst_0 : f32 to vector<8x96xf32>
    %c0_1 = arith.constant 0 : index
    %c160 = arith.constant 160 : index
    %3 = vector.load %arg6[%c0_1, %c160] : memref<8x256xf32, #tpu.memory_space<vmem>>, vector<8x96xf32>
    tpu.vector_store %arg6[%c0_1, %c160], %2 {strides = array<i32>} : memref<8x256xf32, #tpu.memory_space<vmem>>, vector<8x96xf32>,
    %c0_2 = arith.constant 0 : index
    %c0_3 = arith.constant 0 : index
    %4 = vector.load %arg1[%c0_2, %c0_3] : memref<8x32xf32, #tpu.memory_space<vmem>>, vector<8x32xf32>
    %c0_4 = arith.constant 0 : index
    %c0_5 = arith.constant 0 : index
    %5 = vector.load %arg6[%c0_4, %c0_5] : memref<8x256xf32, #tpu.memory_space<vmem>>, vector<8x32xf32>
    tpu.vector_store %arg6[%c0_4, %c0_5], %4 {strides = array<i32>} : memref<8x256xf32, #tpu.memory_space<vmem>>, vector<8x32xf32>,
    %c0_6 = arith.constant 0 : index
    %c0_7 = arith.constant 0 : index
    %6 = vector.load %arg2[%c0_6, %c0_7] : memref<8x32xf32, #tpu.memory_space<vmem>>, vector<8x32xf32>
    %c0_8 = arith.constant 0 : index
    %c128 = arith.constant 128 : index
    %7 = vector.load %arg6[%c0_8, %c128] : memref<8x256xf32, #tpu.memory_space<vmem>>, vector<8x32xf32>
    tpu.vector_store %arg6[%c0_8, %c128], %6 {strides = array<i32>} : memref<8x256xf32, #tpu.memory_space<vmem>>, vector<8x32xf32>,
    %c0_9 = arith.constant 0 : index
    %c0_10 = arith.constant 0 : index
    %8 = vector.load %arg6[%c0_9, %c0_10] : memref<8x256xf32, #tpu.memory_space<vmem>>, vector<8x256xf32>
    %c0_11 = arith.constant 0 : index
    %c0_12 = arith.constant 0 : index
    %9 = vector.load %arg3[%c0_11, %c0_12] : memref<256x128xf32, #tpu.memory_space<vmem>>, vector<256x128xf32>
    %cst_13 = arith.constant dense<0.000000e+00> : vector<8x128xf32>
    %10 = tpu.matmul %8, %9, %cst_13 {dimension_numbers = #tpu.dot_dimension_numbers<[1], [0], [0], [1], [0, 0, 1, 1], [], []>} : vector<8x256xf32>, vector<256x128xf32>, vector<8x128xf32> -> vector<8x128xf32>
    %c0_14 = arith.constant 0 : index
    %c0_15 = arith.constant 0 : index
    %11 = vector.load %arg4[%c0_14, %c0_15] : memref<1x128xf32, #tpu.memory_space<vmem>>, vector<1x128xf32>
    %12 = vector.broadcast %11 : vector<1x128xf32> to vector<8x128xf32>
    %13 = arith.addf %10, %12 : vector<8x128xf32>
    %14 = math.tanh %13 : vector<8x128xf32>
    %c0_16 = arith.constant 0 : index
    %c0_17 = arith.constant 0 : index
    %15 = vector.load %arg5[%c0_16, %c0_17] : memref<8x128xf32, #tpu.memory_space<vmem>>, vector<8x128xf32>
    tpu.vector_store %arg5[%c0_16, %c0_17], %14 {strides = array<i32>} : memref<8x128xf32, #tpu.memory_space<vmem>>, vector<8x128xf32>,
    return
  }
  func.func @transform_0(%arg0: i32) -> (i32, i32) {
    %c0_i32 = arith.constant 0 : i32
    %c0_i32_0 = arith.constant 0 : i32
    return %arg0, %c0_i32 : i32, i32
  }
  func.func @transform_1(%arg0: i32) -> (i32, i32) {
    %c0_i32 = arith.constant 0 : i32
    %c0_i32_0 = arith.constant 0 : i32
    return %arg0, %c0_i32 : i32, i32
  }
  func.func @transform_2(%arg0: i32) -> (i32, i32) {
    %c0_i32 = arith.constant 0 : i32
    %c0_i32_0 = arith.constant 0 : i32
    %c0_i32_1 = arith.constant 0 : i32
    return %c0_i32, %c0_i32_0 : i32, i32
  }
  func.func @transform_3(%arg0: i32) -> (i32, i32) {
    %c0_i32 = arith.constant 0 : i32
    %c0_i32_0 = arith.constant 0 : i32
    %c0_i32_1 = arith.constant 0 : i32
    return %c0_i32, %c0_i32_0 : i32, i32
  }
  func.func @transform_4(%arg0: i32) -> (i32, i32) {
    %c0_i32 = arith.constant 0 : i32
    %c0_i32_0 = arith.constant 0 : i32
    return %arg0, %c0_i32 : i32, i32
  }
}

module attributes {stable_mosaic.version = 11 : i64} {
  func.func @kernel(%arg0: i32, %arg1: memref<8x32xf32, #tpu.memory_space<vmem>>, %arg2: memref<8x32xf32, #tpu.memory_space<vmem>>, %arg3: memref<256x128xf32, #tpu.memory_space<vmem>>, %arg4: memref<1x128xf32, #tpu.memory_space<vmem>>, %arg5: memref<8x128xf32, #tpu.memory_space<vmem>>, %arg6: memref<8x256xf32, #tpu.memory_space<vmem>>) attributes {dimension_semantics = [#tpu.dimension_semantics<parallel>], iteration_bounds = array<i64: 1>, scalar_prefetch = 0 : i64, scratch_operands = 1 : i64, tpu.core_type = #tpu.core_type<tc>, window_params = [{transform_indices = @transform_0, window_bounds = array<i64: 8, 32>}, {transform_indices = @transform_1, window_bounds = array<i64: 8, 32>}, {pipeline_mode = #tpu.pipeline_mode<synchronous>, transform_indices = @transform_2, window_bounds = array<i64: 256, 128>}, {pipeline_mode = #tpu.pipeline_mode<synchronous>, transform_indices = @transform_3, window_bounds = array<i64: 1, 128>}, {transform_indices = @transform_4, window_bounds = array<i64: 8, 128>}]} {
    %cst = arith.constant 0.000000e+00 : f32
    %0 = vector.broadcast %cst : f32 to vector<8x96xf32>
    %c0 = arith.constant 0 : index
    %c32 = arith.constant 32 : index
    %1 = vector.load %arg6[%c0, %c32] : memref<8x256xf32, #tpu.memory_space<vmem>>, vector<8x96xf32>
    tpu.vector_store %arg6[%c0, %c32], %0 {strides = array<i32>} : memref<8x256xf32, #tpu.memory_space<vmem>>, vector<8x96xf32>,
    %cst_0 = arith.constant 0.000000e+00 : f32
    %2 = vector.broadcast %cst_0 : f32 to vector<8x96xf32>
    %c0_1 = arith.constant 0 : index
    %c160 = arith.constant 160 : index
    %3 = vector.load %arg6[%c0_1, %c160] : memref<8x256xf32, #tpu.memory_space<vmem>>, vector<8x96xf32>
    tpu.vector_store %arg6[%c0_1, %c160], %2 {strides = array<i32>} : memref<8x256xf32, #tpu.memory_space<vmem>>, vector<8x96xf32>,
    %c0_2 = arith.constant 0 : index
    %c0_3 = arith.constant 0 : index
    %4 = vector.load %arg1[%c0_2, %c0_3] : memref<8x32xf32, #tpu.memory_space<vmem>>, vector<8x32xf32>
    %c0_4 = arith.constant 0 : index
    %c0_5 = arith.constant 0 : index
    %5 = vector.load %arg6[%c0_4, %c0_5] : memref<8x256xf32, #tpu.memory_space<vmem>>, vector<8x32xf32>
    tpu.vector_store %arg6[%c0_4, %c0_5], %4 {strides = array<i32>} : memref<8x256xf32, #tpu.memory_space<vmem>>, vector<8x32xf32>,
    %c0_6 = arith.constant 0 : index
    %c0_7 = arith.constant 0 : index
    %6 = vector.load %arg2[%c0_6, %c0_7] : memref<8x32xf32, #tpu.memory_space<vmem>>, vector<8x32xf32>
    %c0_8 = arith.constant 0 : index
    %c128 = arith.constant 128 : index
    %7 = vector.load %arg6[%c0_8, %c128] : memref<8x256xf32, #tpu.memory_space<vmem>>, vector<8x32xf32>
    tpu.vector_store %arg6[%c0_8, %c128], %6 {strides = array<i32>} : memref<8x256xf32, #tpu.memory_space<vmem>>, vector<8x32xf32>,
    %c0_9 = arith.constant 0 : index
    %c0_10 = arith.constant 0 : index
    %8 = vector.load %arg6[%c0_9, %c0_10] : memref<8x256xf32, #tpu.memory_space<vmem>>, vector<8x256xf32>
    %c0_11 = arith.constant 0 : index
    %c0_12 = arith.constant 0 : index
    %9 = vector.load %arg3[%c0_11, %c0_12] : memref<256x128xf32, #tpu.memory_space<vmem>>, vector<256x128xf32>
    %cst_13 = arith.constant dense<0.000000e+00> : vector<8x128xf32>
    %10 = tpu.matmul %8, %9, %cst_13 {dimension_numbers = #tpu.dot_dimension_numbers<[1], [0], [0], [1], [0, 0, 1, 1], [], []>} : vector<8x256xf32>, vector<256x128xf32>, vector<8x128xf32> -> vector<8x128xf32>
    %c0_14 = arith.constant 0 : index
    %c0_15 = arith.constant 0 : index
    %11 = vector.load %arg4[%c0_14, %c0_15] : memref<1x128xf32, #tpu.memory_space<vmem>>, vector<1x128xf32>
    %12 = vector.broadcast %11 : vector<1x128xf32> to vector<8x128xf32>
    %13 = arith.addf %10, %12 : vector<8x128xf32>
    %14 = math.tanh %13 : vector<8x128xf32>
    %c0_16 = arith.constant 0 : index
    %c0_17 = arith.constant 0 : index
    %15 = vector.load %arg5[%c0_16, %c0_17] : memref<8x128xf32, #tpu.memory_space<vmem>>, vector<8x128xf32>
    tpu.vector_store %arg5[%c0_16, %c0_17], %14 {strides = array<i32>} : memref<8x128xf32, #tpu.memory_space<vmem>>, vector<8x128xf32>,
    return
  }
  func.func @transform_0(%arg0: i32) -> (i32, i32) {
    %c0_i32 = arith.constant 0 : i32
    %c0_i32_0 = arith.constant 0 : i32
    return %arg0, %c0_i32 : i32, i32
  }
  func.func @transform_1(%arg0: i32) -> (i32, i32) {
    %c0_i32 = arith.constant 0 : i32
    %c0_i32_0 = arith.constant 0 : i32
    return %arg0, %c0_i32 : i32, i32
  }
  func.func @transform_2(%arg0: i32) -> (i32, i32) {
    %c0_i32 = arith.constant 0 : i32
    %c0_i32_0 = arith.constant 0 : i32
    %c0_i32_1 = arith.constant 0 : i32
    return %c0_i32, %c0_i32_0 : i32, i32
  }
  func.func @transform_3(%arg0: i32) -> (i32, i32) {
    %c0_i32 = arith.constant 0 : i32
    %c0_i32_0 = arith.constant 0 : i32
    %c0_i32_1 = arith.constant 0 : i32
    return %c0_i32, %c0_i32_0 : i32, i32
  }
  func.func @transform_4(%arg0: i32) -> (i32, i32) {
    %c0_i32 = arith.constant 0 : i32
    %c0_i32_0 = arith.constant 0 : i32
    return %arg0, %c0_i32 : i32, i32
  }
}

</mosaic_0001>

<bundles_post_ra>
// kernel: tpu_custom_call.1
= control target key start
LH: loop header
LB: loop body
LE: loop exit
PB: predicated region body
PF: predicated region fallthrough
CT: control target
= control target key end

     0   :  { %9 = vsyncpa [#allocation4], 0  ;;  %s446_s0 = inlined_call_operand.hbm [shape: f32[8,32], index: 0, kind: input, shape index: {}]   ;;  %s447_s1 = inlined_call_operand.hbm [shape: f32[8,32], index: 1, kind: input, shape index: {}]   ;;  %s448_s2 = inlined_call_operand.hbm [shape: f32[256,128], index: 2, kind: input, shape index: {}]   ;;  %s449_s3 = inlined_call_operand.vmem [shape: f32[1,128], index: 3, kind: input, shape index: {}]   ;;  %s450_s4 = inlined_call_operand.hbm [shape: f32[8,128], index: 4, kind: output, shape index: {}]  }
   0x1   :  { %10 = vsyncpa [#allocation7], 0 }
   0x2   :  { %11 = vsyncpa [#allocation5], 0  ;;  %s363_s15 = smov [#allocation6]   ;;  %s364_s17 = smov [#allocation3]  }
   0x3   :  { %s28_s16 = sshll.u32 %s363_s15, 4  ;;  %s18_s18 = sshll.u32 %s364_s17, 4  ;;  %s29_s16 = int_to_ptr.vmem [resolvable:$true] %s28_s16  ;;  %s19_s18 = int_to_ptr.vmem [resolvable:$true] %s18_s18 }
   0x4   :  { %s269_s21 = scalar_lea.hbm %s447_s1, 128 }
   0x5   :  { %p270_p0 = scmp.ne.s32.totalorder %s447_s1, %s269_s21  ;;  %p273_p1 = scmp.lt.u32.totalorder %s269_s21, %s447_s1 }
   0x7   :  { %p275_p2 = pnand %p273_p1, %p270_p0 }
   0x9   :  { %278 = shalt.err (!%p275_p2)
}
   0xa   :  { %s279_s26 = scalar_lea.vmem %s29_s16, 128  ;;  %p284_p4 = scmp.lt.s32.totalorder %s29_s16, %s29_s16 }
   0xb   :  { %p280_p3 = scmp.ne.s32.totalorder %s29_s16, %s279_s26  ;;  %p285_p5 = scmp.lt.s32.totalorder %s279_s26, %s279_s26 }
   0xd   :  { %p286_p6 = por %p285_p5, %p284_p4 }
   0xf   :  { %p287_p7 = pnand %p286_p6, %p280_p3 }
  0x11   :  { %290 = shalt.err (!%p287_p7)
}
  0x12   :  { %31 = dma.hbm_to_vmem [thread:$0]  %s447_s1, 128, %s29_s16, [#allocation7]  }
  0x13   :  { %s291_s5 = scalar_lea.hbm %s446_s0, 128 }
  0x14   :  { %p292_p8 = scmp.ne.s32.totalorder %s446_s0, %s291_s5  ;;  %p295_p9 = scmp.lt.u32.totalorder %s291_s5, %s446_s0 }
  0x16   :  { %p297_p10 = pnand %p295_p9, %p292_p8 }
  0x18   :  { %300 = shalt.err (!%p297_p10)
}
  0x19   :  { %s301_s10 = scalar_lea.vmem %s19_s18, 128  ;;  %p306_p12 = scmp.lt.s32.totalorder %s19_s18, %s19_s18 }
  0x1a   :  { %p302_p11 = scmp.ne.s32.totalorder %s19_s18, %s301_s10  ;;  %p307_p13 = scmp.lt.s32.totalorder %s301_s10, %s301_s10 }
  0x1c   :  { %p308_p0 = por %p307_p13, %p306_p12 }
  0x1e   :  { %p309_p1 = pnand %p308_p0, %p302_p11 }
  0x20   :  { %312 = shalt.err (!%p309_p1)
}
  0x21   :  { %21 = dma.hbm_to_vmem [thread:$0]  %s446_s0, 128, %s19_s18, [#allocation4]  }
  0x22   :  { %s365_s12 = smov [#allocation8]   ;;  %s313_s16 = scalar_lea.hbm %s448_s2, 4096 }
  0x23   :  { %s37_s13 = sshll.u32 %s365_s12, 4  ;;  %p314_p2 = scmp.ne.s32.totalorder %s448_s2, %s313_s16  ;;  %s38_s13 = int_to_ptr.vmem [resolvable:$true] %s37_s13 }
  0x24   :  { %p317_p3 = scmp.lt.u32.totalorder %s313_s16, %s448_s2 }
  0x26   :  { %p319_p4 = pnand %p317_p3, %p314_p2 }
  0x28   :  { %322 = shalt.err (!%p319_p4)
}
  0x29   :  { %s323_s22 = scalar_lea.vmem %s38_s13, 4096  ;;  %p328_p6 = scmp.lt.s32.totalorder %s38_s13, %s38_s13 }
  0x2a   :  { %p324_p5 = scmp.ne.s32.totalorder %s38_s13, %s323_s22  ;;  %p329_p7 = scmp.lt.s32.totalorder %s323_s22, %s323_s22 }
  0x2c   :  { %p330_p8 = por %p329_p7, %p328_p6 }
  0x2e   :  { %p331_p9 = pnand %p330_p8, %p324_p5 }
  0x30   :  { %334 = shalt.err (!%p331_p9)
}
  0x31   :  { %s366_s0 = smov 128   ;;  %s367_s18 = smov 8  }
  0x32   :  { %43 = dma.hbm_to_vmem [thread:$0]  %s448_s2, 4096, %s38_s13, [#allocation7], %s366_s0, %s366_s0, %s367_s18  }
  0x33   :  { %357 = dma.done.wait [#allocation4], 128  }
  0x34   :  { %358 = vsyncadd [#allocation4], 4294967168 }
  0x35   :  { %359 = dma.done.wait [#allocation7], 4224  }
  0x36   :  { %360 = vsyncadd [#allocation7], 4294963072  ;;  %vm55_vm0 = vcmask 1047808   ;;  %v368_v0 = vmov 0.0   ;;  %v81_v1 = vld [vmem:[#allocation8 + $0x80] sm:$0xff]  ;;  %v82_v2 = vld [vmem:[#allocation8 + $0x88] sm:$0xff] }
  0x37   :  { %57 = vst.msk [vmem:[#allocation2 + $0x8] sm:$0xff] %vm55_vm0, %v368_v0  ;;  %56 = vst.msk [vmem:[#allocation2] sm:$0xff] %vm55_vm0, %v368_v0  ;;  %v65_v3 = vld [vmem:[#allocation8] sm:$0xff]  ;;  %v228_v4 = vpack.c.bf16 %v82_v2, %v81_v1  ;;  %v66_v5 = vld [vmem:[#allocation8 + $0x8] sm:$0xff]  ;;  %vm59_vm1 = vcmask 261120   ;;  %s369_s26 = smov [#allocation9]  }
  0x38   :  { %v83_v6 = vld [vmem:[#allocation8 + $0x90] sm:$0xff]  ;;  %v84_v7 = vld [vmem:[#allocation8 + $0x98] sm:$0xff]  ;;  %v230_v8 = vpack.c.bf16 %v66_v5, %v65_v3  ;;  %v85_v12 = vld [vmem:[#allocation8 + $0xa0] sm:$0xff]  ;;  %s182_s27 = sshll.u32 %s369_s26, 4  ;;  %s183_s27 = int_to_ptr.vmem [resolvable:$true] %s182_s27 }
  0x39   :  { %v232_v9 = vpack.c.bf16 %v84_v7, %v83_v6  ;;  %v67_v10 = vld [vmem:[#allocation8 + $0x10] sm:$0xff]  ;;  %v68_v11 = vld [vmem:[#allocation8 + $0x18] sm:$0xff]  ;;  %229 = vmatprep.subr.bf16.mxu0 %v228_v4  ;;  %v86_v13 = vld [vmem:[#allocation8 + $0xa8] sm:$0xff]  ;;  %s335_s28 = scalar_lea.vmem %s183_s27, 128  ;;  %p340_p11 = scmp.lt.s32.totalorder %s183_s27, %s183_s27 }
  0x3a   :  { %231 = vmatpush3.bf16.msra.mxu0 %v230_v8  ;;  %v234_v14 = vpack.c.bf16 %v68_v11, %v67_v10  ;;  %v236_v15 = vpack.c.bf16 %v86_v13, %v85_v12  ;;  %v69_v16 = vld [vmem:[#allocation8 + $0x20] sm:$0xff]  ;;  %v70_v17 = vld [vmem:[#allocation8 + $0x28] sm:$0xff]  ;;  %v87_v18 = vld [vmem:[#allocation8 + $0xb0] sm:$0xff]  ;;  %p336_p10 = scmp.ne.s32.totalorder %s183_s27, %s335_s28  ;;  %p341_p12 = scmp.lt.s32.totalorder %s335_s28, %s335_s28 }
  0x3b   :  { %233 = vmatprep.subr.bf16.mxu0 %v232_v9  ;;  %v88_v19 = vld [vmem:[#allocation8 + $0xb8] sm:$0xff]  ;;  %v238_v20 = vpack.c.bf16 %v70_v17, %v69_v16  ;;  %v71_v22 = vld [vmem:[#allocation8 + $0x30] sm:$0xff]  ;;  %v89_v24 = vld [vmem:[#allocation8 + $0xc0] sm:$0xff] }
  0x3c   :  { %v240_v21 = vpack.c.bf16 %v88_v19, %v87_v18  ;;  %v72_v23 = vld [vmem:[#allocation8 + $0x38] sm:$0xff]  ;;  %v90_v25 = vld [vmem:[#allocation8 + $0xc8] sm:$0xff]  ;;  %v58_v27 = vld [vmem:[#allocation3] sm:$0xff]  ;;  %p342_p13 = por %p341_p12, %p340_p11 }
  0x3d   :  { %v61_v26 = vld [vmem:[#allocation6] sm:$0xff]  ;;  %v242_v28 = vpack.c.bf16 %v72_v23, %v71_v22  ;;  %60 = vst.msk [vmem:[#allocation2] sm:$0xff] %vm59_vm1, %v58_v27  ;;  %v244_v29 = vpack.c.bf16 %v90_v25, %v89_v24  ;;  %v73_v30 = vld [vmem:[#allocation8 + $0x40] sm:$0xff]  ;;  %v74_v31 = vld [vmem:[#allocation8 + $0x48] sm:$0xff] }
  0x3e   :  { %235 = vmatpush3.bf16.msra.mxu0 %v234_v14  ;;  %62 = vst.msk [vmem:[#allocation2 + $0x8] sm:$0xff] %vm59_vm1, %v61_v26  ;;  %v91_v32 = vld [vmem:[#allocation8 + $0xd0] sm:$0xff]  ;;  %v92_v33 = vld [vmem:[#allocation8 + $0xd8] sm:$0xff]  ;;  %v246_v34 = vpack.c.bf16 %v74_v31, %v73_v30  ;;  %v93_v38 = vld [vmem:[#allocation8 + $0xe0] sm:$0xff]  ;;  %p343_p0 = pnand %p342_p13, %p336_p10 }
  0x3f   :  { %237 = vmatprep.subr.bf16.mxu0 %v236_v15  ;;  %v248_v35 = vpack.c.bf16 %v92_v33, %v91_v32  ;;  %v75_v36 = vld [vmem:[#allocation8 + $0x50] sm:$0xff]  ;;  %v76_v37 = vld [vmem:[#allocation8 + $0x58] sm:$0xff]  ;;  %v94_v39 = vld [vmem:[#allocation8 + $0xe8] sm:$0xff] }
  0x40   :  { %v250_v41 = vpack.c.bf16 %v76_v37, %v75_v36  ;;  %v252_v42 = vpack.c.bf16 %v94_v39, %v93_v38  ;;  %v77_v43 = vld [vmem:[#allocation8 + $0x60] sm:$0xff]  ;;  %v78_v44 = vld [vmem:[#allocation8 + $0x68] sm:$0xff]  ;;  %v95_v45 = vld [vmem:[#allocation8 + $0xf0] sm:$0xff] }
  0x41   :  { %v96_v46 = vld [vmem:[#allocation8 + $0xf8] sm:$0xff]  ;;  %v254_v47 = vpack.c.bf16 %v78_v44, %v77_v43  ;;  %v79_v49 = vld [vmem:[#allocation8 + $0x70] sm:$0xff]  ;;  %v192_v54 = vld [vmem:[%s449_s3] ss:$0 sm:$0xff] }
  0x42   :  { %239 = vmatpush3.bf16.msra.mxu0 %v238_v20  ;;  %v256_v48 = vpack.c.bf16 %v96_v46, %v95_v45  ;;  %v80_v50 = vld [vmem:[#allocation8 + $0x78] sm:$0xff] }
  0x43   :  { %241 = vmatprep.subr.bf16.mxu0 %v240_v21  ;;  %v258_v51 = vpack.c.bf16 %v80_v50, %v79_v49 }
  0x44   :  { %v63_v52 = vld [vmem:[#allocation2] sm:$0xff] }
  0x45   :  { %v64_v40 = vld [vmem:[#allocation2 + $0x8] sm:$0xff] }
  0x46   :  { %243 = vmatpush3.bf16.msra.mxu0 %v242_v28  ;;  %168 = vmatprep.mubr.f32.mxu0 %v64_v40 }
  0x47   :  { %245 = vmatprep.subr.bf16.mxu0 %v244_v29 }
  0x4a   :  { %247 = vmatpush3.bf16.msra.mxu0 %v246_v34 }
  0x4b   :  { %249 = vmatprep.subr.bf16.mxu0 %v248_v35 }
  0x4e   :  { %251 = vmatpush3.bf16.msra.mxu0 %v250_v41 }
  0x4f   :  { %253 = vmatprep.subr.bf16.mxu0 %v252_v42 }
  0x52   :  { %255 = vmatpush3.bf16.msra.mxu0 %v254_v47 }
  0x53   :  { %257 = vmatprep.subr.bf16.mxu0 %v256_v48 }
  0x56   :  { %259 = vmatpush3.bf16.msra.mxu0 %v258_v51 }
  0x59   :  { %169 = vmatmul.mubr.f32.vlgmr.msra.gmra.mrb[0].mxu0 %v63_v52 }
 0x12c   :  { %v225_v53 = vpop.f32.mrb[0].mxu0 }
 0x12d   :  { %v226_v55 = vpop.f32.mrb[1].mxu0 }
 0x12e   :  { %v227_v56 = vadd.f32 %v226_v55, %v225_v53 }
 0x130   :  { %v171_v57 = vadd.f32 %v227_v56, %v192_v54 }
 0x132   :  { %267 = vtanh.f32 %v171_v57 }
 0x13c   :  { %v268_v58 = vpop.eup %267 }
 0x13d   :  { %175 = vst [vmem:[#allocation9] sm:$0xff] %v268_v58 }
 0x13e   :  { %346 = shalt.err (!%p343_p0)
}
 0x13f   :  { %s347_s3 = scalar_lea.hbm %s450_s4, 128 }
 0x140   :  { %p348_p1 = scmp.ne.s32.totalorder %s450_s4, %s347_s3  ;;  %p351_p2 = scmp.lt.u32.totalorder %s347_s3, %s450_s4 }
 0x142   :  { %p353_p3 = pnand %p351_p2, %p348_p1 }
 0x144   :  { %356 = shalt.err (!%p353_p3)
}
 0x145   :  { %185 = dma.vmem_to_hbm [thread:$0]  %s183_s27, 128, %s450_s4, [#allocation5]  }
 0x146   :  { %361 = dma.done.wait [#allocation5], 128  }
 0x147   :  { %362 = vsyncadd [#allocation5], 4294967168 }
 0x148   :  { %189 = vsyncpa [#allocation4], 1 }
 0x149   :  { %190 = vsyncpa [#allocation7], 1 }
 0x14a   :  { %191 = vsyncpa [#allocation5], 1 }

// kernel: tpu_custom_call.1
= control target key start
LH: loop header
LB: loop body
LE: loop exit
PB: predicated region body
PF: predicated region fallthrough
CT: control target
= control target key end

     0   :  { %9 = vsyncpa [#allocation4], 0  ;;  %s446_s0 = inlined_call_operand.hbm [shape: f32[8,32], index: 0, kind: input, shape index: {}]   ;;  %s447_s1 = inlined_call_operand.hbm [shape: f32[8,32], index: 1, kind: input, shape index: {}]   ;;  %s448_s2 = inlined_call_operand.hbm [shape: f32[256,128], index: 2, kind: input, shape index: {}]   ;;  %s449_s3 = inlined_call_operand.vmem [shape: f32[1,128], index: 3, kind: input, shape index: {}]   ;;  %s450_s4 = inlined_call_operand.hbm [shape: f32[8,128], index: 4, kind: output, shape index: {}]  }
   0x1   :  { %10 = vsyncpa [#allocation7], 0 }
   0x2   :  { %11 = vsyncpa [#allocation5], 0  ;;  %s363_s15 = smov [#allocation6]   ;;  %s364_s17 = smov [#allocation3]  }
   0x3   :  { %s28_s16 = sshll.u32 %s363_s15, 4  ;;  %s18_s18 = sshll.u32 %s364_s17, 4  ;;  %s29_s16 = int_to_ptr.vmem [resolvable:$true] %s28_s16  ;;  %s19_s18 = int_to_ptr.vmem [resolvable:$true] %s18_s18 }
   0x4   :  { %s269_s21 = scalar_lea.hbm %s447_s1, 128 }
   0x5   :  { %p270_p0 = scmp.ne.s32.totalorder %s447_s1, %s269_s21  ;;  %p273_p1 = scmp.lt.u32.totalorder %s269_s21, %s447_s1 }
   0x7   :  { %p275_p2 = pnand %p273_p1, %p270_p0 }
   0x9   :  { %278 = shalt.err (!%p275_p2)
}
   0xa   :  { %s279_s26 = scalar_lea.vmem %s29_s16, 128  ;;  %p284_p4 = scmp.lt.s32.totalorder %s29_s16, %s29_s16 }
   0xb   :  { %p280_p3 = scmp.ne.s32.totalorder %s29_s16, %s279_s26  ;;  %p285_p5 = scmp.lt.s32.totalorder %s279_s26, %s279_s26 }
   0xd   :  { %p286_p6 = por %p285_p5, %p284_p4 }
   0xf   :  { %p287_p7 = pnand %p286_p6, %p280_p3 }
  0x11   :  { %290 = shalt.err (!%p287_p7)
}
  0x12   :  { %31 = dma.hbm_to_vmem [thread:$0]  %s447_s1, 128, %s29_s16, [#allocation7]  }
  0x13   :  { %s291_s5 = scalar_lea.hbm %s446_s0, 128 }
  0x14   :  { %p292_p8 = scmp.ne.s32.totalorder %s446_s0, %s291_s5  ;;  %p295_p9 = scmp.lt.u32.totalorder %s291_s5, %s446_s0 }
  0x16   :  { %p297_p10 = pnand %p295_p9, %p292_p8 }
  0x18   :  { %300 = shalt.err (!%p297_p10)
}
  0x19   :  { %s301_s10 = scalar_lea.vmem %s19_s18, 128  ;;  %p306_p12 = scmp.lt.s32.totalorder %s19_s18, %s19_s18 }
  0x1a   :  { %p302_p11 = scmp.ne.s32.totalorder %s19_s18, %s301_s10  ;;  %p307_p13 = scmp.lt.s32.totalorder %s301_s10, %s301_s10 }
  0x1c   :  { %p308_p0 = por %p307_p13, %p306_p12 }
  0x1e   :  { %p309_p1 = pnand %p308_p0, %p302_p11 }
  0x20   :  { %312 = shalt.err (!%p309_p1)
}
  0x21   :  { %21 = dma.hbm_to_vmem [thread:$0]  %s446_s0, 128, %s19_s18, [#allocation4]  }
  0x22   :  { %s365_s12 = smov [#allocation8]   ;;  %s313_s16 = scalar_lea.hbm %s448_s2, 4096 }
  0x23   :  { %s37_s13 = sshll.u32 %s365_s12, 4  ;;  %p314_p2 = scmp.ne.s32.totalorder %s448_s2, %s313_s16  ;;  %s38_s13 = int_to_ptr.vmem [resolvable:$true] %s37_s13 }
  0x24   :  { %p317_p3 = scmp.lt.u32.totalorder %s313_s16, %s448_s2 }
  0x26   :  { %p319_p4 = pnand %p317_p3, %p314_p2 }
  0x28   :  { %322 = shalt.err (!%p319_p4)
}
  0x29   :  { %s323_s22 = scalar_lea.vmem %s38_s13, 4096  ;;  %p328_p6 = scmp.lt.s32.totalorder %s38_s13, %s38_s13 }
  0x2a   :  { %p324_p5 = scmp.ne.s32.totalorder %s38_s13, %s323_s22  ;;  %p329_p7 = scmp.lt.s32.totalorder %s323_s22, %s323_s22 }
  0x2c   :  { %p330_p8 = por %p329_p7, %p328_p6 }
  0x2e   :  { %p331_p9 = pnand %p330_p8, %p324_p5 }
  0x30   :  { %334 = shalt.err (!%p331_p9)
}
  0x31   :  { %s366_s0 = smov 128   ;;  %s367_s18 = smov 8  }
  0x32   :  { %43 = dma.hbm_to_vmem [thread:$0]  %s448_s2, 4096, %s38_s13, [#allocation7], %s366_s0, %s366_s0, %s367_s18  }
  0x33   :  { %357 = dma.done.wait [#allocation4], 128  }
  0x34   :  { %358 = vsyncadd [#allocation4], 4294967168 }
  0x35   :  { %359 = dma.done.wait [#allocation7], 4224  }
  0x36   :  { %360 = vsyncadd [#allocation7], 4294963072  ;;  %vm55_vm0 = vcmask 1047808   ;;  %v368_v0 = vmov 0.0   ;;  %v81_v1 = vld [vmem:[#allocation8 + $0x80] sm:$0xff]  ;;  %v82_v2 = vld [vmem:[#allocation8 + $0x88] sm:$0xff] }
  0x37   :  { %57 = vst.msk [vmem:[#allocation2 + $0x8] sm:$0xff] %vm55_vm0, %v368_v0  ;;  %56 = vst.msk [vmem:[#allocation2] sm:$0xff] %vm55_vm0, %v368_v0  ;;  %v65_v3 = vld [vmem:[#allocation8] sm:$0xff]  ;;  %v228_v4 = vpack.c.bf16 %v82_v2, %v81_v1  ;;  %v66_v5 = vld [vmem:[#allocation8 + $0x8] sm:$0xff]  ;;  %vm59_vm1 = vcmask 261120   ;;  %s369_s26 = smov [#allocation9]  }
  0x38   :  { %v83_v6 = vld [vmem:[#allocation8 + $0x90] sm:$0xff]  ;;  %v84_v7 = vld [vmem:[#allocation8 + $0x98] sm:$0xff]  ;;  %v230_v8 = vpack.c.bf16 %v66_v5, %v65_v3  ;;  %v85_v12 = vld [vmem:[#allocation8 + $0xa0] sm:$0xff]  ;;  %s182_s27 = sshll.u32 %s369_s26, 4  ;;  %s183_s27 = int_to_ptr.vmem [resolvable:$true] %s182_s27 }
  0x39   :  { %v232_v9 = vpack.c.bf16 %v84_v7, %v83_v6  ;;  %v67_v10 = vld [vmem:[#allocation8 + $0x10] sm:$0xff]  ;;  %v68_v11 = vld [vmem:[#allocation8 + $0x18] sm:$0xff]  ;;  %229 = vmatprep.subr.bf16.mxu0 %v228_v4  ;;  %v86_v13 = vld [vmem:[#allocation8 + $0xa8] sm:$0xff]  ;;  %s335_s28 = scalar_lea.vmem %s183_s27, 128  ;;  %p340_p11 = scmp.lt.s32.totalorder %s183_s27, %s183_s27 }
  0x3a   :  { %231 = vmatpush3.bf16.msra.mxu0 %v230_v8  ;;  %v234_v14 = vpack.c.bf16 %v68_v11, %v67_v10  ;;  %v236_v15 = vpack.c.bf16 %v86_v13, %v85_v12  ;;  %v69_v16 = vld [vmem:[#allocation8 + $0x20] sm:$0xff]  ;;  %v70_v17 = vld [vmem:[#allocation8 + $0x28] sm:$0xff]  ;;  %v87_v18 = vld [vmem:[#allocation8 + $0xb0] sm:$0xff]  ;;  %p336_p10 = scmp.ne.s32.totalorder %s183_s27, %s335_s28  ;;  %p341_p12 = scmp.lt.s32.totalorder %s335_s28, %s335_s28 }
  0x3b   :  { %233 = vmatprep.subr.bf16.mxu0 %v232_v9  ;;  %v88_v19 = vld [vmem:[#allocation8 + $0xb8] sm:$0xff]  ;;  %v238_v20 = vpack.c.bf16 %v70_v17, %v69_v16  ;;  %v71_v22 = vld [vmem:[#allocation8 + $0x30] sm:$0xff]  ;;  %v89_v24 = vld [vmem:[#allocation8 + $0xc0] sm:$0xff] }
  0x3c   :  { %v240_v21 = vpack.c.bf16 %v88_v19, %v87_v18  ;;  %v72_v23 = vld [vmem:[#allocation8 + $0x38] sm:$0xff]  ;;  %v90_v25 = vld [vmem:[#allocation8 + $0xc8] sm:$0xff]  ;;  %v58_v27 = vld [vmem:[#allocation3] sm:$0xff]  ;;  %p342_p13 = por %p341_p12, %p340_p11 }
  0x3d   :  { %v61_v26 = vld [vmem:[#allocation6] sm:$0xff]  ;;  %v242_v28 = vpack.c.bf16 %v72_v23, %v71_v22  ;;  %60 = vst.msk [vmem:[#allocation2] sm:$0xff] %vm59_vm1, %v58_v27  ;;  %v244_v29 = vpack.c.bf16 %v90_v25, %v89_v24  ;;  %v73_v30 = vld [vmem:[#allocation8 + $0x40] sm:$0xff]  ;;  %v74_v31 = vld [vmem:[#allocation8 + $0x48] sm:$0xff] }
  0x3e   :  { %235 = vmatpush3.bf16.msra.mxu0 %v234_v14  ;;  %62 = vst.msk [vmem:[#allocation2 + $0x8] sm:$0xff] %vm59_vm1, %v61_v26  ;;  %v91_v32 = vld [vmem:[#allocation8 + $0xd0] sm:$0xff]  ;;  %v92_v33 = vld [vmem:[#allocation8 + $0xd8] sm:$0xff]  ;;  %v246_v34 = vpack.c.bf16 %v74_v31, %v73_v30  ;;  %v93_v38 = vld [vmem:[#allocation8 + $0xe0] sm:$0xff]  ;;  %p343_p0 = pnand %p342_p13, %p336_p10 }
  0x3f   :  { %237 = vmatprep.subr.bf16.mxu0 %v236_v15  ;;  %v248_v35 = vpack.c.bf16 %v92_v33, %v91_v32  ;;  %v75_v36 = vld [vmem:[#allocation8 + $0x50] sm:$0xff]  ;;  %v76_v37 = vld [vmem:[#allocation8 + $0x58] sm:$0xff]  ;;  %v94_v39 = vld [vmem:[#allocation8 + $0xe8] sm:$0xff] }
  0x40   :  { %v250_v41 = vpack.c.bf16 %v76_v37, %v75_v36  ;;  %v252_v42 = vpack.c.bf16 %v94_v39, %v93_v38  ;;  %v77_v43 = vld [vmem:[#allocation8 + $0x60] sm:$0xff]  ;;  %v78_v44 = vld [vmem:[#allocation8 + $0x68] sm:$0xff]  ;;  %v95_v45 = vld [vmem:[#allocation8 + $0xf0] sm:$0xff] }
  0x41   :  { %v96_v46 = vld [vmem:[#allocation8 + $0xf8] sm:$0xff]  ;;  %v254_v47 = vpack.c.bf16 %v78_v44, %v77_v43  ;;  %v79_v49 = vld [vmem:[#allocation8 + $0x70] sm:$0xff]  ;;  %v192_v54 = vld [vmem:[%s449_s3] ss:$0 sm:$0xff] }
  0x42   :  { %239 = vmatpush3.bf16.msra.mxu0 %v238_v20  ;;  %v256_v48 = vpack.c.bf16 %v96_v46, %v95_v45  ;;  %v80_v50 = vld [vmem:[#allocation8 + $0x78] sm:$0xff] }
  0x43   :  { %241 = vmatprep.subr.bf16.mxu0 %v240_v21  ;;  %v258_v51 = vpack.c.bf16 %v80_v50, %v79_v49 }
  0x44   :  { %v63_v52 = vld [vmem:[#allocation2] sm:$0xff] }
  0x45   :  { %v64_v40 = vld [vmem:[#allocation2 + $0x8] sm:$0xff] }
  0x46   :  { %243 = vmatpush3.bf16.msra.mxu0 %v242_v28  ;;  %168 = vmatprep.mubr.f32.mxu0 %v64_v40 }
  0x47   :  { %245 = vmatprep.subr.bf16.mxu0 %v244_v29 }
  0x4a   :  { %247 = vmatpush3.bf16.msra.mxu0 %v246_v34 }
  0x4b   :  { %249 = vmatprep.subr.bf16.mxu0 %v248_v35 }
  0x4e   :  { %251 = vmatpush3.bf16.msra.mxu0 %v250_v41 }
  0x4f   :  { %253 = vmatprep.subr.bf16.mxu0 %v252_v42 }
  0x52   :  { %255 = vmatpush3.bf16.msra.mxu0 %v254_v47 }
  0x53   :  { %257 = vmatprep.subr.bf16.mxu0 %v256_v48 }
  0x56   :  { %259 = vmatpush3.bf16.msra.mxu0 %v258_v51 }
  0x59   :  { %169 = vmatmul.mubr.f32.vlgmr.msra.gmra.mrb[0].mxu0 %v63_v52 }
 0x12c   :  { %v225_v53 = vpop.f32.mrb[0].mxu0 }
 0x12d   :  { %v226_v55 = vpop.f32.mrb[1].mxu0 }
 0x12e   :  { %v227_v56 = vadd.f32 %v226_v55, %v225_v53 }
 0x130   :  { %v171_v57 = vadd.f32 %v227_v56, %v192_v54 }
 0x132   :  { %267 = vtanh.f32 %v171_v57 }
 0x13c   :  { %v268_v58 = vpop.eup %267 }
 0x13d   :  { %175 = vst [vmem:[#allocation9] sm:$0xff] %v268_v58 }
 0x13e   :  { %346 = shalt.err (!%p343_p0)
}
 0x13f   :  { %s347_s3 = scalar_lea.hbm %s450_s4, 128 }
 0x140   :  { %p348_p1 = scmp.ne.s32.totalorder %s450_s4, %s347_s3  ;;  %p351_p2 = scmp.lt.u32.totalorder %s347_s3, %s450_s4 }
 0x142   :  { %p353_p3 = pnand %p351_p2, %p348_p1 }
 0x144   :  { %356 = shalt.err (!%p353_p3)
}
 0x145   :  { %185 = dma.vmem_to_hbm [thread:$0]  %s183_s27, 128, %s450_s4, [#allocation5]  }
 0x146   :  { %361 = dma.done.wait [#allocation5], 128  }
 0x147   :  { %362 = vsyncadd [#allocation5], 4294967168 }
 0x148   :  { %189 = vsyncpa [#allocation4], 1 }
 0x149   :  { %190 = vsyncpa [#allocation7], 1 }
 0x14a   :  { %191 = vsyncpa [#allocation5], 1 }

</bundles_post_ra>
